<compile_context>
chip_gen: v7x
topology: tpu7x:2x2x1
jax: 0.10.0
libtpu: 0.0.40
codegen_flags: <defaults>
</compile_context>

<pallas_src>
import functools

import jax
import jax.numpy as jnp
from jax import lax
from jax.experimental import pallas as pl
from jax.experimental.pallas import tpu as pltpu

INPUT_SIZE = 28
HIDDEN = 64
OUT_FEATURES = 18
GATE_PAD = 128                      # per-gate column padding = one lane tile
GP = 4 * GATE_PAD                   # padded gate width (512)


def lstm_linear_kernel(x_ref, wih_ref, whh_ref, b_ref, wout_ref, bout_ref,
                       out_ref, xproj_ref, *, seq_len, batch):
    """Single-layer LSTM over the full sequence + final Linear, all in VMEM.

    x_ref    : (T*Bp, I)      bf16  time-major, batch-padded, flattened input
    wih_ref  : (I, 4*128)     bf16  input->gates weights, per-gate lane-padded
    whh_ref  : (H, 4*128)     bf16  hidden->gates weights, per-gate lane-padded
    b_ref    : (1, 4*128)     f32   bias_ih + bias_hh, per-gate lane-padded
    wout_ref : (H, 18)        f32   final linear weight (transposed)
    bout_ref : (1, 18)        f32   final linear bias
    out_ref  : (Bp, 18)       f32   output
    xproj_ref: (T*Bp, 4*128)  f32   scratch: precomputed input projection
    """
    H = HIDDEN
    HP = GATE_PAD

    # (1) Input projection + bias for ALL timesteps in one MXU call, entirely
    #     off the serial recurrence.
    xproj_ref[...] = (
        jnp.dot(x_ref[...], wih_ref[...], preferred_element_type=jnp.float32)
        + b_ref[...])

    # (2) Hoist the recurrent weight out of the loop (bf16 (64,512) = 16 vregs).
    whh = whh_ref[...]

    def step(t, carry):
        h, c = carry                                     # (Bp, H) f32, vreg-resident
        row = pl.multiple_of(t * batch, batch)           # sublane-tile aligned
        x_t = xproj_ref[pl.ds(row, batch), :]            # (Bp, 4*HP) precomputed
        # v7x note: written as dot(...) + x_t so the h@Whh result accumulates
        # onto the precomputed projection (MRB in-place accumulate friendly).
        gates = jnp.dot(h.astype(jnp.bfloat16), whh,
                        preferred_element_type=jnp.float32) + x_t
        # PyTorch gate order [i | f | g | o]; every slice starts on a 128-lane
        # tile boundary -> no cross-lane (XLU) work.  Elementwise math in f32.
        i_g = jax.nn.sigmoid(gates[:, 0 * HP:0 * HP + H])
        f_g = jax.nn.sigmoid(gates[:, 1 * HP:1 * HP + H])
        g_g = jnp.tanh(gates[:, 2 * HP:2 * HP + H])
        o_g = jax.nn.sigmoid(gates[:, 3 * HP:3 * HP + H])
        c_new = f_g * c + i_g * g_g
        h_new = o_g * jnp.tanh(c_new)
        return h_new, c_new

    h0 = jnp.zeros((batch, H), jnp.float32)
    c0 = jnp.zeros((batch, H), jnp.float32)
    h_last, _ = lax.fori_loop(0, seq_len, step, (h0, c0), unroll=True)

    # out = Linear(h_T)  (one-time, kept in f32)
    out_ref[...] = (jnp.dot(h_last, wout_ref[...],
                            preferred_element_type=jnp.float32)
                    + bout_ref[...])


def _pad_gate_cols(w):
    """(rows, 4*H) -> (rows, 4*GATE_PAD): each 64-wide gate block is placed at
    the start of its own 128-lane tile, zero-padded on the right."""
    rows = w.shape[0]
    w4 = w.reshape(rows, 4, HIDDEN)
    out = jnp.zeros((rows, 4, GATE_PAD), w.dtype).at[:, :, :HIDDEN].set(w4)
    return out.reshape(rows, 4 * GATE_PAD)


@jax.jit
def rnn_forward(x, params):
    """x: (B, T, INPUT_SIZE) float32 -> (B, 18) float32."""
    B, T, I = x.shape
    assert I == INPUT_SIZE
    Bp = max(8, (B + 7) // 8 * 8)                           # sublane-pad batch

    # time-major, batch-padded, flattened to (T*Bp, I); bf16 for the MXU.
    x_tm = jnp.transpose(x, (1, 0, 2)).astype(jnp.float32)  # (T, B, I)
    x_tm = jnp.pad(x_tm, ((0, 0), (0, Bp - B), (0, 0)))
    x_flat = x_tm.reshape(T * Bp, I).astype(jnp.bfloat16)

    wih_p = _pad_gate_cols(params["w_ih"].T).astype(jnp.bfloat16)   # (I, 512)
    whh_p = _pad_gate_cols(params["w_hh"].T).astype(jnp.bfloat16)   # (H, 512)
    b_p = _pad_gate_cols(
        (params["b_ih"] + params["b_hh"]).reshape(1, 4 * HIDDEN)
    ).astype(jnp.float32)                                           # (1, 512)
    wout_t = params["w_out"].T.astype(jnp.float32)                  # (H, 18)
    bout = params["b_out"].reshape(1, OUT_FEATURES).astype(jnp.float32)

    vmem = pl.BlockSpec(memory_space=pltpu.MemorySpace.VMEM)
    kernel = functools.partial(lstm_linear_kernel, seq_len=T, batch=Bp)
    out_p = pl.pallas_call(
        kernel,
        out_shape=jax.ShapeDtypeStruct((Bp, OUT_FEATURES), jnp.float32),
        in_specs=[vmem] * 6,
        out_specs=vmem,
        scratch_shapes=[pltpu.VMEM((T * Bp, GP), jnp.float32)],
    )(x_flat, wih_p, whh_p, b_p, wout_t, bout)
    # NOTE: if B or T scale up (esp. on v7x's 64 MiB VMEM), tile the batch with
    # a grid + BlockSpec marked "parallel"; at these sizes a single
    # VMEM-resident invocation is optimal.
    return out_p[:B]


def rnn_reference(x, params):
    """Pure-JAX f32 reference with the PyTorch module's semantics."""
    B, T, _ = x.shape
    H = HIDDEN
    h = jnp.zeros((B, H), jnp.float32)
    c = jnp.zeros((B, H), jnp.float32)
    b = params["b_ih"] + params["b_hh"]
    for t in range(T):
        gates = x[:, t, :] @ params["w_ih"].T + h @ params["w_hh"].T + b
        i = jax.nn.sigmoid(gates[:, 0 * H:1 * H])
        f = jax.nn.sigmoid(gates[:, 1 * H:2 * H])
        g = jnp.tanh(gates[:, 2 * H:3 * H])
        o = jax.nn.sigmoid(gates[:, 3 * H:4 * H])
        c = f * c + i * g
        h = o * jnp.tanh(c)
    return h @ params["w_out"].T + params["b_out"]


def init_params(key):
    """Deterministic init; shapes match torch.nn.LSTM(28, 64) + Linear(64, 18)."""
    ks = jax.random.split(key, 6)
    bound = 1.0 / jnp.sqrt(jnp.float32(HIDDEN))
    u = lambda k, shape: jax.random.uniform(k, shape, jnp.float32, -bound, bound)
    return {
        "w_ih": u(ks[0], (4 * HIDDEN, INPUT_SIZE)),   # weight_ih_l0
        "w_hh": u(ks[1], (4 * HIDDEN, HIDDEN)),       # weight_hh_l0
        "b_ih": u(ks[2], (4 * HIDDEN,)),              # bias_ih_l0
        "b_hh": u(ks[3], (4 * HIDDEN,)),              # bias_hh_l0
        "w_out": u(ks[4], (OUT_FEATURES, HIDDEN)),    # Linear.weight
        "b_out": u(ks[5], (OUT_FEATURES,)),           # Linear.bias
    }


if __name__ == "__main__":
    key = jax.random.PRNGKey(0)
    kx, kp = jax.random.split(key)

    B, T = 2, 8
    x = jax.random.normal(kx, (B, T, INPUT_SIZE), jnp.float32)
    params = init_params(kp)

    out = jax.block_until_ready(rnn_forward(x, params))
    ref = rnn_reference(x, params)

    assert out.shape == (B, OUT_FEATURES)
    # bf16 MXU matmuls (f32 accumulate) vs f32 reference -> loosened tolerance.
    assert jnp.allclose(out, ref, atol=3e-2, rtol=3e-2), "mismatch vs reference"
    print("KERNEL_OK")
</pallas_src>

<mosaic_0001>
module attributes {stable_mosaic.version = 11 : i64} {
  func.func @lstm_linear_kernel(%arg0: memref<64x28xbf16, #tpu.memory_space<vmem>>, %arg1: memref<28x512xbf16, #tpu.memory_space<vmem>>, %arg2: memref<64x512xbf16, #tpu.memory_space<vmem>>, %arg3: memref<1x512xf32, #tpu.memory_space<vmem>>, %arg4: memref<64x18xf32, #tpu.memory_space<vmem>>, %arg5: memref<1x18xf32, #tpu.memory_space<vmem>>, %arg6: memref<8x18xf32, #tpu.memory_space<vmem>>, %arg7: memref<64x512xf32, #tpu.memory_space<vmem>>) attributes {dimension_semantics = [], scalar_prefetch = 0 : i64, scratch_operands = 1 : i64, tpu.core_type = #tpu.core_type<tc>} {
    %c0 = arith.constant 0 : index
    %c0_0 = arith.constant 0 : index
    %0 = vector.load %arg0[%c0, %c0_0] : memref<64x28xbf16, #tpu.memory_space<vmem>>, vector<64x28xbf16>
    %c0_1 = arith.constant 0 : index
    %c0_2 = arith.constant 0 : index
    %1 = vector.load %arg1[%c0_1, %c0_2] : memref<28x512xbf16, #tpu.memory_space<vmem>>, vector<28x512xbf16>
    %cst = arith.constant dense<0.000000e+00> : vector<64x512xf32>
    %2 = tpu.matmul %0, %1, %cst {dimension_numbers = #tpu.dot_dimension_numbers<[1], [0], [0], [1], [0, 0, 1, 1], [], []>} : vector<64x28xbf16>, vector<28x512xbf16>, vector<64x512xf32> -> vector<64x512xf32>
    %c0_3 = arith.constant 0 : index
    %c0_4 = arith.constant 0 : index
    %3 = vector.load %arg3[%c0_3, %c0_4] : memref<1x512xf32, #tpu.memory_space<vmem>>, vector<1x512xf32>
    %4 = vector.broadcast %3 : vector<1x512xf32> to vector<64x512xf32>
    %5 = arith.addf %2, %4 : vector<64x512xf32>
    %c0_5 = arith.constant 0 : index
    %c0_6 = arith.constant 0 : index
    %6 = vector.load %arg7[%c0_5, %c0_6] : memref<64x512xf32, #tpu.memory_space<vmem>>, vector<64x512xf32>
    tpu.vector_store %arg7[%c0_5, %c0_6], %5 {strides = array<i32>} : memref<64x512xf32, #tpu.memory_space<vmem>>, vector<64x512xf32>,
    %c0_7 = arith.constant 0 : index
    %c0_8 = arith.constant 0 : index
    %7 = vector.load %arg2[%c0_7, %c0_8] : memref<64x512xbf16, #tpu.memory_space<vmem>>, vector<64x512xbf16>
    %cst_9 = arith.constant 0.000000e+00 : f32
    %8 = vector.broadcast %cst_9 : f32 to vector<8x64xf32>
    %cst_10 = arith.constant 0.000000e+00 : f32
    %9 = vector.broadcast %cst_10 : f32 to vector<8x64xf32>
    %c0_i32 = arith.constant 0 : i32
    %c8_i32 = arith.constant 8 : i32
    %10 = arith.muli %c0_i32, %c8_i32 : i32
    %11 = tpu.assume_multiple %10, 8 : i32
    %12 = arith.index_cast %11 : i32 to index
    %c0_11 = arith.constant 0 : index
    %13 = vector.load %arg7[%12, %c0_11] : memref<64x512xf32, #tpu.memory_space<vmem>>, vector<8x512xf32>
    %14 = arith.truncf %8 : vector<8x64xf32> to vector<8x64xbf16>
    %cst_12 = arith.constant dense<0.000000e+00> : vector<8x512xf32>
    %15 = tpu.matmul %14, %7, %cst_12 {dimension_numbers = #tpu.dot_dimension_numbers<[1], [0], [0], [1], [0, 0, 1, 1], [], []>} : vector<8x64xbf16>, vector<64x512xbf16>, vector<8x512xf32> -> vector<8x512xf32>
    %16 = arith.addf %15, %13 : vector<8x512xf32>
    %17 = vector.extract_strided_slice %16 {offsets = [0, 0], sizes = [8, 64], strides = [1, 1]} : vector<8x512xf32> to vector<8x64xf32>
    %18 = arith.negf %17 : vector<8x64xf32>
    %19 = math.exp %18 : vector<8x64xf32>
    %cst_13 = arith.constant 1.000000e+00 : f32
    %20 = vector.broadcast %cst_13 : f32 to vector<8x64xf32>
    %21 = arith.addf %20, %19 : vector<8x64xf32>
    %22 = arith.divf %20, %21 : vector<8x64xf32>
    %23 = vector.extract_strided_slice %16 {offsets = [0, 128], sizes = [8, 64], strides = [1, 1]} : vector<8x512xf32> to vector<8x64xf32>
    %24 = arith.negf %23 : vector<8x64xf32>
    %25 = math.exp %24 : vector<8x64xf32>
    %cst_14 = arith.constant 1.000000e+00 : f32
    %26 = vector.broadcast %cst_14 : f32 to vector<8x64xf32>
    %27 = arith.addf %26, %25 : vector<8x64xf32>
    %28 = arith.divf %26, %27 : vector<8x64xf32>
    %29 = vector.extract_strided_slice %16 {offsets = [0, 256], sizes = [8, 64], strides = [1, 1]} : vector<8x512xf32> to vector<8x64xf32>
    %30 = math.tanh %29 : vector<8x64xf32>
    %31 = vector.extract_strided_slice %16 {offsets = [0, 384], sizes = [8, 64], strides = [1, 1]} : vector<8x512xf32> to vector<8x64xf32>
    %32 = arith.negf %31 : vector<8x64xf32>
    %33 = math.exp %32 : vector<8x64xf32>
    %cst_15 = arith.constant 1.000000e+00 : f32
    %34 = vector.broadcast %cst_15 : f32 to vector<8x64xf32>
    %35 = arith.addf %34, %33 : vector<8x64xf32>
    %36 = arith.divf %34, %35 : vector<8x64xf32>
    %37 = arith.mulf %28, %9 : vector<8x64xf32>
    %38 = arith.mulf %22, %30 : vector<8x64xf32>
    %39 = arith.addf %37, %38 : vector<8x64xf32>
    %40 = math.tanh %39 : vector<8x64xf32>
    %41 = arith.mulf %36, %40 : vector<8x64xf32>
    %c1_i32 = arith.constant 1 : i32
    %c8_i32_16 = arith.constant 8 : i32
    %42 = arith.muli %c1_i32, %c8_i32_16 : i32
    %43 = tpu.assume_multiple %42, 8 : i32
    %44 = arith.index_cast %43 : i32 to index
    %c0_17 = arith.constant 0 : index
    %45 = vector.load %arg7[%44, %c0_17] : memref<64x512xf32, #tpu.memory_space<vmem>>, vector<8x512xf32>
    %46 = arith.truncf %41 : vector<8x64xf32> to vector<8x64xbf16>
    %cst_18 = arith.constant dense<0.000000e+00> : vector<8x512xf32>
    %47 = tpu.matmul %46, %7, %cst_18 {dimension_numbers = #tpu.dot_dimension_numbers<[1], [0], [0], [1], [0, 0, 1, 1], [], []>} : vector<8x64xbf16>, vector<64x512xbf16>, vector<8x512xf32> -> vector<8x512xf32>
    %48 = arith.addf %47, %45 : vector<8x512xf32>
    %49 = vector.extract_strided_slice %48 {offsets = [0, 0], sizes = [8, 64], strides = [1, 1]} : vector<8x512xf32> to vector<8x64xf32>
    %50 = arith.negf %49 : vector<8x64xf32>
    %51 = math.exp %50 : vector<8x64xf32>
    %cst_19 = arith.constant 1.000000e+00 : f32
    %52 = vector.broadcast %cst_19 : f32 to vector<8x64xf32>
    %53 = arith.addf %52, %51 : vector<8x64xf32>
    %54 = arith.divf %52, %53 : vector<8x64xf32>
    %55 = vector.extract_strided_slice %48 {offsets = [0, 128], sizes = [8, 64], strides = [1, 1]} : vector<8x512xf32> to vector<8x64xf32>
    %56 = arith.negf %55 : vector<8x64xf32>
    %57 = math.exp %56 : vector<8x64xf32>
    %cst_20 = arith.constant 1.000000e+00 : f32
    %58 = vector.broadcast %cst_20 : f32 to vector<8x64xf32>
    %59 = arith.addf %58, %57 : vector<8x64xf32>
    %60 = arith.divf %58, %59 : vector<8x64xf32>
    %61 = vector.extract_strided_slice %48 {offsets = [0, 256], sizes = [8, 64], strides = [1, 1]} : vector<8x512xf32> to vector<8x64xf32>
    %62 = math.tanh %61 : vector<8x64xf32>
    %63 = vector.extract_strided_slice %48 {offsets = [0, 384], sizes = [8, 64], strides = [1, 1]} : vector<8x512xf32> to vector<8x64xf32>
    %64 = arith.negf %63 : vector<8x64xf32>
    %65 = math.exp %64 : vector<8x64xf32>
    %cst_21 = arith.constant 1.000000e+00 : f32
    %66 = vector.broadcast %cst_21 : f32 to vector<8x64xf32>
    %67 = arith.addf %66, %65 : vector<8x64xf32>
    %68 = arith.divf %66, %67 : vector<8x64xf32>
    %69 = arith.mulf %60, %39 : vector<8x64xf32>
    %70 = arith.mulf %54, %62 : vector<8x64xf32>
    %71 = arith.addf %69, %70 : vector<8x64xf32>
    %72 = math.tanh %71 : vector<8x64xf32>
    %73 = arith.mulf %68, %72 : vector<8x64xf32>
    %c2_i32 = arith.constant 2 : i32
    %c8_i32_22 = arith.constant 8 : i32
    %74 = arith.muli %c2_i32, %c8_i32_22 : i32
    %75 = tpu.assume_multiple %74, 8 : i32
    %76 = arith.index_cast %75 : i32 to index
    %c0_23 = arith.constant 0 : index
    %77 = vector.load %arg7[%76, %c0_23] : memref<64x512xf32, #tpu.memory_space<vmem>>, vector<8x512xf32>
    %78 = arith.truncf %73 : vector<8x64xf32> to vector<8x64xbf16>
    %cst_24 = arith.constant dense<0.000000e+00> : vector<8x512xf32>
    %79 = tpu.matmul %78, %7, %cst_24 {dimension_numbers = #tpu.dot_dimension_numbers<[1], [0], [0], [1], [0, 0, 1, 1], [], []>} : vector<8x64xbf16>, vector<64x512xbf16>, vector<8x512xf32> -> vector<8x512xf32>
    %80 = arith.addf %79, %77 : vector<8x512xf32>
    %81 = vector.extract_strided_slice %80 {offsets = [0, 0], sizes = [8, 64], strides = [1, 1]} : vector<8x512xf32> to vector<8x64xf32>
    %82 = arith.negf %81 : vector<8x64xf32>
    %83 = math.exp %82 : vector<8x64xf32>
    %cst_25 = arith.constant 1.000000e+00 : f32
    %84 = vector.broadcast %cst_25 : f32 to vector<8x64xf32>
    %85 = arith.addf %84, %83 : vector<8x64xf32>
    %86 = arith.divf %84, %85 : vector<8x64xf32>
    %87 = vector.extract_strided_slice %80 {offsets = [0, 128], sizes = [8, 64], strides = [1, 1]} : vector<8x512xf32> to vector<8x64xf32>
    %88 = arith.negf %87 : vector<8x64xf32>
    %89 = math.exp %88 : vector<8x64xf32>
    %cst_26 = arith.constant 1.000000e+00 : f32
    %90 = vector.broadcast %cst_26 : f32 to vector<8x64xf32>
    %91 = arith.addf %90, %89 : vector<8x64xf32>
    %92 = arith.divf %90, %91 : vector<8x64xf32>
    %93 = vector.extract_strided_slice %80 {offsets = [0, 256], sizes = [8, 64], strides = [1, 1]} : vector<8x512xf32> to vector<8x64xf32>
    %94 = math.tanh %93 : vector<8x64xf32>
    %95 = vector.extract_strided_slice %80 {offsets = [0, 384], sizes = [8, 64], strides = [1, 1]} : vector<8x512xf32> to vector<8x64xf32>
    %96 = arith.negf %95 : vector<8x64xf32>
    %97 = math.exp %96 : vector<8x64xf32>
    %cst_27 = arith.constant 1.000000e+00 : f32
    %98 = vector.broadcast %cst_27 : f32 to vector<8x64xf32>
    %99 = arith.addf %98, %97 : vector<8x64xf32>
    %100 = arith.divf %98, %99 : vector<8x64xf32>
    %101 = arith.mulf %92, %71 : vector<8x64xf32>
    %102 = arith.mulf %86, %94 : vector<8x64xf32>
    %103 = arith.addf %101, %102 : vector<8x64xf32>
    %104 = math.tanh %103 : vector<8x64xf32>
    %105 = arith.mulf %100, %104 : vector<8x64xf32>
    %c3_i32 = arith.constant 3 : i32
    %c8_i32_28 = arith.constant 8 : i32
    %106 = arith.muli %c3_i32, %c8_i32_28 : i32
    %107 = tpu.assume_multiple %106, 8 : i32
    %108 = arith.index_cast %107 : i32 to index
    %c0_29 = arith.constant 0 : index
    %109 = vector.load %arg7[%108, %c0_29] : memref<64x512xf32, #tpu.memory_space<vmem>>, vector<8x512xf32>
    %110 = arith.truncf %105 : vector<8x64xf32> to vector<8x64xbf16>
    %cst_30 = arith.constant dense<0.000000e+00> : vector<8x512xf32>
    %111 = tpu.matmul %110, %7, %cst_30 {dimension_numbers = #tpu.dot_dimension_numbers<[1], [0], [0], [1], [0, 0, 1, 1], [], []>} : vector<8x64xbf16>, vector<64x512xbf16>, vector<8x512xf32> -> vector<8x512xf32>
    %112 = arith.addf %111, %109 : vector<8x512xf32>
    %113 = vector.extract_strided_slice %112 {offsets = [0, 0], sizes = [8, 64], strides = [1, 1]} : vector<8x512xf32> to vector<8x64xf32>
    %114 = arith.negf %113 : vector<8x64xf32>
    %115 = math.exp %114 : vector<8x64xf32>
    %cst_31 = arith.constant 1.000000e+00 : f32
    %116 = vector.broadcast %cst_31 : f32 to vector<8x64xf32>
    %117 = arith.addf %116, %115 : vector<8x64xf32>
    %118 = arith.divf %116, %117 : vector<8x64xf32>
    %119 = vector.extract_strided_slice %112 {offsets = [0, 128], sizes = [8, 64], strides = [1, 1]} : vector<8x512xf32> to vector<8x64xf32>
    %120 = arith.negf %119 : vector<8x64xf32>
    %121 = math.exp %120 : vector<8x64xf32>
    %cst_32 = arith.constant 1.000000e+00 : f32
    %122 = vector.broadcast %cst_32 : f32 to vector<8x64xf32>
    %123 = arith.addf %122, %121 : vector<8x64xf32>
    %124 = arith.divf %122, %123 : vector<8x64xf32>
    %125 = vector.extract_strided_slice %112 {offsets = [0, 256], sizes = [8, 64], strides = [1, 1]} : vector<8x512xf32> to vector<8x64xf32>
    %126 = math.tanh %125 : vector<8x64xf32>
    %127 = vector.extract_strided_slice %112 {offsets = [0, 384], sizes = [8, 64], strides = [1, 1]} : vector<8x512xf32> to vector<8x64xf32>
    %128 = arith.negf %127 : vector<8x64xf32>
    %129 = math.exp %128 : vector<8x64xf32>
    %cst_33 = arith.constant 1.000000e+00 : f32
    %130 = vector.broadcast %cst_33 : f32 to vector<8x64xf32>
    %131 = arith.addf %130, %129 : vector<8x64xf32>
    %132 = arith.divf %130, %131 : vector<8x64xf32>
    %133 = arith.mulf %124, %103 : vector<8x64xf32>
    %134 = arith.mulf %118, %126 : vector<8x64xf32>
    %135 = arith.addf %133, %134 : vector<8x64xf32>
    %136 = math.tanh %135 : vector<8x64xf32>
    %137 = arith.mulf %132, %136 : vector<8x64xf32>
    %c4_i32 = arith.constant 4 : i32
    %c8_i32_34 = arith.constant 8 : i32
    %138 = arith.muli %c4_i32, %c8_i32_34 : i32
    %139 = tpu.assume_multiple %138, 8 : i32
    %140 = arith.index_cast %139 : i32 to index
    %c0_35 = arith.constant 0 : index
    %141 = vector.load %arg7[%140, %c0_35] : memref<64x512xf32, #tpu.memory_space<vmem>>, vector<8x512xf32>
    %142 = arith.truncf %137 : vector<8x64xf32> to vector<8x64xbf16>
    %cst_36 = arith.constant dense<0.000000e+00> : vector<8x512xf32>
    %143 = tpu.matmul %142, %7, %cst_36 {dimension_numbers = #tpu.dot_dimension_numbers<[1], [0], [0], [1], [0, 0, 1, 1], [], []>} : vector<8x64xbf16>, vector<64x512xbf16>, vector<8x512xf32> -> vector<8x512xf32>
    %144 = arith.addf %143, %141 : vector<8x512xf32>
    %145 = vector.extract_strided_slice %144 {offsets = [0, 0], sizes = [8, 64], strides = [1, 1]} : vector<8x512xf32> to vector<8x64xf32>
    %146 = arith.negf %145 : vector<8x64xf32>
    %147 = math.exp %146 : vector<8x64xf32>
    %cst_37 = arith.constant 1.000000e+00 : f32
    %148 = vector.broadcast %cst_37 : f32 to vector<8x64xf32>
    %149 = arith.addf %148, %147 : vector<8x64xf32>
    %150 = arith.divf %148, %149 : vector<8x64xf32>
    %151 = vector.extract_strided_slice %144 {offsets = [0, 128], sizes = [8, 64], strides = [1, 1]} : vector<8x512xf32> to vector<8x64xf32>
    %152 = arith.negf %151 : vector<8x64xf32>
    %153 = math.exp %152 : vector<8x64xf32>
    %cst_38 = arith.constant 1.000000e+00 : f32
    %154 = vector.broadcast %cst_38 : f32 to vector<8x64xf32>
    %155 = arith.addf %154, %153 : vector<8x64xf32>
    %156 = arith.divf %154, %155 : vector<8x64xf32>
    %157 = vector.extract_strided_slice %144 {offsets = [0, 256], sizes = [8, 64], strides = [1, 1]} : vector<8x512xf32> to vector<8x64xf32>
    %158 = math.tanh %157 : vector<8x64xf32>
    %159 = vector.extract_strided_slice %144 {offsets = [0, 384], sizes = [8, 64], strides = [1, 1]} : vector<8x512xf32> to vector<8x64xf32>
    %160 = arith.negf %159 : vector<8x64xf32>
    %161 = math.exp %160 : vector<8x64xf32>
    %cst_39 = arith.constant 1.000000e+00 : f32
    %162 = vector.broadcast %cst_39 : f32 to vector<8x64xf32>
    %163 = arith.addf %162, %161 : vector<8x64xf32>
    %164 = arith.divf %162, %163 : vector<8x64xf32>
    %165 = arith.mulf %156, %135 : vector<8x64xf32>
    %166 = arith.mulf %150, %158 : vector<8x64xf32>
    %167 = arith.addf %165, %166 : vector<8x64xf32>
    %168 = math.tanh %167 : vector<8x64xf32>
    %169 = arith.mulf %164, %168 : vector<8x64xf32>
    %c5_i32 = arith.constant 5 : i32
    %c8_i32_40 = arith.constant 8 : i32
    %170 = arith.muli %c5_i32, %c8_i32_40 : i32
    %171 = tpu.assume_multiple %170, 8 : i32
    %172 = arith.index_cast %171 : i32 to index
    %c0_41 = arith.constant 0 : index
    %173 = vector.load %arg7[%172, %c0_41] : memref<64x512xf32, #tpu.memory_space<vmem>>, vector<8x512xf32>
    %174 = arith.truncf %169 : vector<8x64xf32> to vector<8x64xbf16>
    %cst_42 = arith.constant dense<0.000000e+00> : vector<8x512xf32>
    %175 = tpu.matmul %174, %7, %cst_42 {dimension_numbers = #tpu.dot_dimension_numbers<[1], [0], [0], [1], [0, 0, 1, 1], [], []>} : vector<8x64xbf16>, vector<64x512xbf16>, vector<8x512xf32> -> vector<8x512xf32>
    %176 = arith.addf %175, %173 : vector<8x512xf32>
    %177 = vector.extract_strided_slice %176 {offsets = [0, 0], sizes = [8, 64], strides = [1, 1]} : vector<8x512xf32> to vector<8x64xf32>
    %178 = arith.negf %177 : vector<8x64xf32>
    %179 = math.exp %178 : vector<8x64xf32>
    %cst_43 = arith.constant 1.000000e+00 : f32
    %180 = vector.broadcast %cst_43 : f32 to vector<8x64xf32>
    %181 = arith.addf %180, %179 : vector<8x64xf32>
    %182 = arith.divf %180, %181 : vector<8x64xf32>
    %183 = vector.extract_strided_slice %176 {offsets = [0, 128], sizes = [8, 64], strides = [1, 1]} : vector<8x512xf32> to vector<8x64xf32>
    %184 = arith.negf %183 : vector<8x64xf32>
    %185 = math.exp %184 : vector<8x64xf32>
    %cst_44 = arith.constant 1.000000e+00 : f32
    %186 = vector.broadcast %cst_44 : f32 to vector<8x64xf32>
    %187 = arith.addf %186, %185 : vector<8x64xf32>
    %188 = arith.divf %186, %187 : vector<8x64xf32>
    %189 = vector.extract_strided_slice %176 {offsets = [0, 256], sizes = [8, 64], strides = [1, 1]} : vector<8x512xf32> to vector<8x64xf32>
    %190 = math.tanh %189 : vector<8x64xf32>
    %191 = vector.extract_strided_slice %176 {offsets = [0, 384], sizes = [8, 64], strides = [1, 1]} : vector<8x512xf32> to vector<8x64xf32>
    %192 = arith.negf %191 : vector<8x64xf32>
    %193 = math.exp %192 : vector<8x64xf32>
    %cst_45 = arith.constant 1.000000e+00 : f32
    %194 = vector.broadcast %cst_45 : f32 to vector<8x64xf32>
    %195 = arith.addf %194, %193 : vector<8x64xf32>
    %196 = arith.divf %194, %195 : vector<8x64xf32>
    %197 = arith.mulf %188, %167 : vector<8x64xf32>
    %198 = arith.mulf %182, %190 : vector<8x64xf32>
    %199 = arith.addf %197, %198 : vector<8x64xf32>
    %200 = math.tanh %199 : vector<8x64xf32>
    %201 = arith.mulf %196, %200 : vector<8x64xf32>
    %c6_i32 = arith.constant 6 : i32
    %c8_i32_46 = arith.constant 8 : i32
    %202 = arith.muli %c6_i32, %c8_i32_46 : i32
    %203 = tpu.assume_multiple %202, 8 : i32
    %204 = arith.index_cast %203 : i32 to index
    %c0_47 = arith.constant 0 : index
    %205 = vector.load %arg7[%204, %c0_47] : memref<64x512xf32, #tpu.memory_space<vmem>>, vector<8x512xf32>
    %206 = arith.truncf %201 : vector<8x64xf32> to vector<8x64xbf16>
    %cst_48 = arith.constant dense<0.000000e+00> : vector<8x512xf32>
    %207 = tpu.matmul %206, %7, %cst_48 {dimension_numbers = #tpu.dot_dimension_numbers<[1], [0], [0], [1], [0, 0, 1, 1], [], []>} : vector<8x64xbf16>, vector<64x512xbf16>, vector<8x512xf32> -> vector<8x512xf32>
    %208 = arith.addf %207, %205 : vector<8x512xf32>
    %209 = vector.extract_strided_slice %208 {offsets = [0, 0], sizes = [8, 64], strides = [1, 1]} : vector<8x512xf32> to vector<8x64xf32>
    %210 = arith.negf %209 : vector<8x64xf32>
    %211 = math.exp %210 : vector<8x64xf32>
    %cst_49 = arith.constant 1.000000e+00 : f32
    %212 = vector.broadcast %cst_49 : f32 to vector<8x64xf32>
    %213 = arith.addf %212, %211 : vector<8x64xf32>
    %214 = arith.divf %212, %213 : vector<8x64xf32>
    %215 = vector.extract_strided_slice %208 {offsets = [0, 128], sizes = [8, 64], strides = [1, 1]} : vector<8x512xf32> to vector<8x64xf32>
    %216 = arith.negf %215 : vector<8x64xf32>
    %217 = math.exp %216 : vector<8x64xf32>
    %cst_50 = arith.constant 1.000000e+00 : f32
    %218 = vector.broadcast %cst_50 : f32 to vector<8x64xf32>
    %219 = arith.addf %218, %217 : vector<8x64xf32>
    %220 = arith.divf %218, %219 : vector<8x64xf32>
    %221 = vector.extract_strided_slice %208 {offsets = [0, 256], sizes = [8, 64], strides = [1, 1]} : vector<8x512xf32> to vector<8x64xf32>
    %222 = math.tanh %221 : vector<8x64xf32>
    %223 = vector.extract_strided_slice %208 {offsets = [0, 384], sizes = [8, 64], strides = [1, 1]} : vector<8x512xf32> to vector<8x64xf32>
    %224 = arith.negf %223 : vector<8x64xf32>
    %225 = math.exp %224 : vector<8x64xf32>
    %cst_51 = arith.constant 1.000000e+00 : f32
    %226 = vector.broadcast %cst_51 : f32 to vector<8x64xf32>
    %227 = arith.addf %226, %225 : vector<8x64xf32>
    %228 = arith.divf %226, %227 : vector<8x64xf32>
    %229 = arith.mulf %220, %199 : vector<8x64xf32>
    %230 = arith.mulf %214, %222 : vector<8x64xf32>
    %231 = arith.addf %229, %230 : vector<8x64xf32>
    %232 = math.tanh %231 : vector<8x64xf32>
    %233 = arith.mulf %228, %232 : vector<8x64xf32>
    %c7_i32 = arith.constant 7 : i32
    %c8_i32_52 = arith.constant 8 : i32
    %234 = arith.muli %c7_i32, %c8_i32_52 : i32
    %235 = tpu.assume_multiple %234, 8 : i32
    %236 = arith.index_cast %235 : i32 to index
    %c0_53 = arith.constant 0 : index
    %237 = vector.load %arg7[%236, %c0_53] : memref<64x512xf32, #tpu.memory_space<vmem>>, vector<8x512xf32>
    %238 = arith.truncf %233 : vector<8x64xf32> to vector<8x64xbf16>
    %cst_54 = arith.constant dense<0.000000e+00> : vector<8x512xf32>
    %239 = tpu.matmul %238, %7, %cst_54 {dimension_numbers = #tpu.dot_dimension_numbers<[1], [0], [0], [1], [0, 0, 1, 1], [], []>} : vector<8x64xbf16>, vector<64x512xbf16>, vector<8x512xf32> -> vector<8x512xf32>
    %240 = arith.addf %239, %237 : vector<8x512xf32>
    %241 = vector.extract_strided_slice %240 {offsets = [0, 0], sizes = [8, 64], strides = [1, 1]} : vector<8x512xf32> to vector<8x64xf32>
    %242 = arith.negf %241 : vector<8x64xf32>
    %243 = math.exp %242 : vector<8x64xf32>
    %cst_55 = arith.constant 1.000000e+00 : f32
    %244 = vector.broadcast %cst_55 : f32 to vector<8x64xf32>
    %245 = arith.addf %244, %243 : vector<8x64xf32>
    %246 = arith.divf %244, %245 : vector<8x64xf32>
    %247 = vector.extract_strided_slice %240 {offsets = [0, 128], sizes = [8, 64], strides = [1, 1]} : vector<8x512xf32> to vector<8x64xf32>
    %248 = arith.negf %247 : vector<8x64xf32>
    %249 = math.exp %248 : vector<8x64xf32>
    %cst_56 = arith.constant 1.000000e+00 : f32
    %250 = vector.broadcast %cst_56 : f32 to vector<8x64xf32>
    %251 = arith.addf %250, %249 : vector<8x64xf32>
    %252 = arith.divf %250, %251 : vector<8x64xf32>
    %253 = vector.extract_strided_slice %240 {offsets = [0, 256], sizes = [8, 64], strides = [1, 1]} : vector<8x512xf32> to vector<8x64xf32>
    %254 = math.tanh %253 : vector<8x64xf32>
    %255 = vector.extract_strided_slice %240 {offsets = [0, 384], sizes = [8, 64], strides = [1, 1]} : vector<8x512xf32> to vector<8x64xf32>
    %256 = arith.negf %255 : vector<8x64xf32>
    %257 = math.exp %256 : vector<8x64xf32>
    %cst_57 = arith.constant 1.000000e+00 : f32
    %258 = vector.broadcast %cst_57 : f32 to vector<8x64xf32>
    %259 = arith.addf %258, %257 : vector<8x64xf32>
    %260 = arith.divf %258, %259 : vector<8x64xf32>
    %261 = arith.mulf %252, %231 : vector<8x64xf32>
    %262 = arith.mulf %246, %254 : vector<8x64xf32>
    %263 = arith.addf %261, %262 : vector<8x64xf32>
    %264 = math.tanh %263 : vector<8x64xf32>
    %265 = arith.mulf %260, %264 : vector<8x64xf32>
    %c8_i32_58 = arith.constant 8 : i32
    %c0_59 = arith.constant 0 : index
    %c0_60 = arith.constant 0 : index
    %266 = vector.load %arg4[%c0_59, %c0_60] : memref<64x18xf32, #tpu.memory_space<vmem>>, vector<64x18xf32>
    %cst_61 = arith.constant dense<0.000000e+00> : vector<8x18xf32>
    %267 = tpu.matmul %265, %266, %cst_61 {dimension_numbers = #tpu.dot_dimension_numbers<[1], [0], [0], [1], [0, 0, 1, 1], [], []>} : vector<8x64xf32>, vector<64x18xf32>, vector<8x18xf32> -> vector<8x18xf32>
    %c0_62 = arith.constant 0 : index
    %c0_63 = arith.constant 0 : index
    %268 = vector.load %arg5[%c0_62, %c0_63] : memref<1x18xf32, #tpu.memory_space<vmem>>, vector<1x18xf32>
    %269 = vector.broadcast %268 : vector<1x18xf32> to vector<8x18xf32>
    %270 = arith.addf %267, %269 : vector<8x18xf32>
    %c0_64 = arith.constant 0 : index
    %c0_65 = arith.constant 0 : index
    %271 = vector.load %arg6[%c0_64, %c0_65] : memref<8x18xf32, #tpu.memory_space<vmem>>, vector<8x18xf32>
    tpu.vector_store %arg6[%c0_64, %c0_65], %270 {strides = array<i32>} : memref<8x18xf32, #tpu.memory_space<vmem>>, vector<8x18xf32>,
    return
  }
}

</mosaic_0001>

<bundles_post_ra>
// kernel: rnn_forward.1
= control target key start
LH: loop header
LB: loop body
LE: loop exit
PB: predicated region body
PF: predicated region fallthrough
CT: control target
= control target key end

     0   :  { %v2231_v1 = vmov 0   ;;  %vm131_vm0 = vcmask 1045504   ;;  %vm118_vm1 = vcmask 228352   ;;  %v42_v31 = vlaneseq  ;;  %s2224_s1 = inlined_call_operand.vmem [shape: bf16[28,512], index: 1, kind: input, shape index: {}]   ;;  %s2225_s0 = inlined_call_operand.vmem [shape: bf16[64,28], index: 0, kind: input, shape index: {}]   ;;  %s2226_s2 = inlined_call_operand.vmem [shape: bf16[64,512], index: 2, kind: input, shape index: {}]   ;;  %s2227_s3 = inlined_call_operand.vmem [shape: f32[1,512], index: 3, kind: input, shape index: {}]   ;;  %s2228_s4 = inlined_call_operand.vmem [shape: f32[64,18], index: 4, kind: input, shape index: {}]   ;;  %s2229_s5 = inlined_call_operand.vmem [shape: f32[1,18], index: 5, kind: input, shape index: {}]   ;;  %s2230_s6 = inlined_call_operand.vmem [shape: f32[8,18], index: 6, kind: output, shape index: {}]  }
   0x1   :  { %v1577_v0 = vld [vmem:[%s2224_s1 + $0x4] ss:$16 sps:$4 sm:$0xff]   ;;  %176 = vmatprep.mubr.bf16.mxu0 %v2231_v1  ;;  %249 = vmatprep.mubr.bf16.mxu1 %v2231_v1  ;;  %v1579_v2 = vld [vmem:[%s2224_s1 + $0xc] ss:$16 sps:$4 sm:$0xff]   ;;  %v1581_v3 = vld [vmem:[%s2224_s1] ss:$16 sps:$4 sm:$0xff]  }
   0x2   :  { %144 = vmatprep.subr.bf16.mxu0 %v1577_v0  ;;  %v1582_v4 = vld [vmem:[%s2224_s1 + $0x8] ss:$16 sps:$4 sm:$0xff]   ;;  %217 = vmatprep.subr.bf16.mxu1 %v1579_v2  ;;  %v1583_v5 = vld [vmem:[%s2224_s1 + $0x24] ss:$16 sps:$4 sm:$0x3f]   ;;  %v43_v32 = vshrl.u32 %v42_v31, 7 }
   0x3   :  { %145 = vmatpush1.bf16.msra.mxu0 %v1581_v3  ;;  %218 = vmatpush1.bf16.msra.mxu1 %v1582_v4  ;;  %v1585_v6 = vld [vmem:[%s2224_s1 + $0x2c] ss:$16 sps:$4 sm:$0x3f]   ;;  %v1587_v7 = vld [vmem:[%s2224_s1 + $0x20] ss:$16 sps:$4 sm:$0x3f]  }
   0x4   :  { %1467 = vmatprep.subr.msk.bf16.mxu0 %vm131_vm0, %v1583_v5  ;;  %v1588_v8 = vld [vmem:[%s2224_s1 + $0x28] ss:$16 sps:$4 sm:$0x3f]   ;;  %1472 = vmatprep.subr.msk.bf16.mxu1 %vm131_vm0, %v1585_v6  ;;  %v133_v9 = vsel %vm131_vm0, %v1587_v7, 0  ;;  %v1589_v11 = vld [vmem:[%s2225_s0] sm:$0xff]   ;;  %v1599_v28 = vld [vmem:[%s2225_s0 + $0x10] sm:$0xff]  }
   0x5   :  { %v139_v10 = vsel %vm131_vm0, %v1588_v8, 0  ;;  %v1816_v12 = vld [vmem:[%s2226_s2 + $0x4] ss:$16 sps:$4 sm:$0xff]   ;;  %v1821_v13 = vld [vmem:[%s2226_s2] ss:$16 sps:$4 sm:$0xff]   ;;  %v1593_v20 = vld [vmem:[%s2225_s0 + $0x8] sm:$0xff]  }
   0x6   :  { %v1827_v14 = vld [vmem:[%s2226_s2 + $0x24] ss:$16 sps:$4 sm:$0xff]   ;;  %v1834_v15 = vld [vmem:[%s2226_s2 + $0xc] ss:$16 sps:$4 sm:$0xff]   ;;  %v1841_v16 = vld [vmem:[%s2226_s2 + $0x20] ss:$16 sps:$4 sm:$0xff]  }
   0x7   :  { %147 = vmatpush1.bf16.msra.mxu0 %v133_v9  ;;  %220 = vmatpush1.bf16.msra.mxu1 %v139_v10  ;;  %v1848_v17 = vld [vmem:[%s2226_s2 + $0x44] ss:$16 sps:$4 sm:$0xff]   ;;  %v1853_v18 = vld [vmem:[%s2226_s2 + $0x8] ss:$16 sps:$4 sm:$0xff]   ;;  %v1859_v19 = vld [vmem:[%s2226_s2 + $0x2c] ss:$16 sps:$4 sm:$0xff]  }
   0x8   :  { %429 = vmatprep.subr.bf16.mxu0 %v1816_v12  ;;  %470 = vmatprep.subr.bf16.mxu1 %v1834_v15  ;;  %v1869_v21 = vld [vmem:[%s2226_s2 + $0x40] ss:$16 sps:$4 sm:$0xff]   ;;  %v1876_v22 = vld [vmem:[%s2226_s2 + $0x28] ss:$16 sps:$4 sm:$0xff]   ;;  %v1881_v23 = vld [vmem:[%s2226_s2 + $0x64] ss:$16 sps:$4 sm:$0xff]  }
   0x9   :  { %v1886_v24 = vld [vmem:[%s2226_s2 + $0x4c] ss:$16 sps:$4 sm:$0xff]   ;;  %v1897_v25 = vld [vmem:[%s2226_s2 + $0x60] ss:$16 sps:$4 sm:$0xff]   ;;  %v1902_v26 = vld [vmem:[%s2226_s2 + $0x48] ss:$16 sps:$4 sm:$0xff]  }
   0xa   :  { %1468 = vmatmul.mubr.msk.bf16.vlgmr.msra.gmra.mrb[0].mxu0 %vm118_vm1, %v1589_v11  ;;  %1473 = vmatmul.mubr.msk.bf16.vlgmr.msra.gmra.mrb[0].mxu1 %vm118_vm1, %v1589_v11  ;;  %v1909_v27 = vld [vmem:[%s2226_s2 + $0x6c] ss:$16 sps:$4 sm:$0xff]   ;;  %v1919_v29 = vld [vmem:[%s2226_s2 + $0x68] ss:$16 sps:$4 sm:$0xff]   ;;  %v52_v33 = vsub.s32 2, %v43_v32  ;;  %v56_v34 = vsub.s32 3, %v43_v32 }
   0xb   :  { %430 = vmatpush1.bf16.msra.mxu0 %v1821_v13  ;;  %186 = vmatprep.mubr.bf16.mxu0 %v2231_v1  ;;  %v1607_v30 = vld [vmem:[%s2225_s0 + $0x18] sm:$0xff]   ;;  %v44_v35 = vsub.s32 0, %v43_v32  ;;  %v40_v36 = vld [vmem:[%s2227_s3] sm:$0xf]  ;;  %v48_v37 = vsub.s32 1, %v43_v32  ;;  %vm425_vm2 = vcmask 523264  }
   0xc   :  { %259 = vmatprep.mubr.bf16.mxu1 %v2231_v1  ;;  %431 = vmatprep.subr.bf16.mxu0 %v1827_v14  ;;  %v1959_v38 = vrot.slane %v40_v36, %v52_v33  ;;  %v1965_v41 = vrot.slane %v40_v36, %v56_v34  ;;  %vm1747_vm3 = vmmov 0   ;;  %vm1442_vm4 = vcmask 146432  }
   0xd   :  { %471 = vmatpush1.bf16.msra.mxu1 %v1853_v18  ;;  %v45_v42 = vrot.slane %v40_v36, %v44_v35  ;;  %v49_v45 = vrot.slane %v40_v36, %v48_v37 }
   0xe   :  { %472 = vmatprep.subr.bf16.mxu1 %v1859_v19 }
   0xf   :  { %432 = vmatpush1.bf16.msra.mxu0 %v1841_v16 }
  0x10   :  { %433 = vmatprep.subr.bf16.mxu0 %v1848_v17 }
  0x11   :  { %473 = vmatpush1.bf16.msra.mxu1 %v1876_v22 }
  0x12   :  { %1469 = vmatmul.mubr.msk.bf16.gmra.mrb[4].mxu0 %vm118_vm1, %v1593_v20  ;;  %1474 = vmatmul.mubr.msk.bf16.gmra.mrb[4].mxu1 %vm118_vm1, %v1593_v20 }
  0x13   :  { %196 = vmatprep.mubr.bf16.mxu0 %v2231_v1  ;;  %269 = vmatprep.mubr.bf16.mxu1 %v2231_v1 }
  0x14   :  { %434 = vmatpush1.bf16.msra.mxu0 %v1869_v21  ;;  %474 = vmatprep.subr.bf16.mxu1 %v1886_v24 }
  0x15   :  { %435 = vmatprep.subr.bf16.mxu0 %v1881_v23  ;;  %475 = vmatpush1.bf16.msra.mxu1 %v1902_v26 }
  0x16   :  { %476 = vmatprep.subr.bf16.mxu1 %v1909_v27 }
  0x18   :  { %436 = vmatpush1.bf16.msra.mxu0 %v1897_v25 }
  0x19   :  { %546 = vmatprep.subr.bf16.mxu0 %v1816_v12  ;;  %477 = vmatpush1.bf16.msra.mxu1 %v1919_v29 }
  0x1a   :  { %1470 = vmatmul.mubr.msk.bf16.gmra.mrb[8].mxu0 %vm118_vm1, %v1599_v28  ;;  %1475 = vmatmul.mubr.msk.bf16.gmra.mrb[8].mxu1 %vm118_vm1, %v1599_v28 }
  0x1b   :  { %206 = vmatprep.mubr.bf16.mxu0 %v2231_v1  ;;  %279 = vmatprep.mubr.bf16.mxu1 %v2231_v1 }
  0x1c   :  { %587 = vmatprep.subr.bf16.mxu1 %v1834_v15 }
  0x22   :  { %1471 = vmatmul.mubr.msk.bf16.gmra.mrb[12].mxu0 %vm118_vm1, %v1607_v30  ;;  %1476 = vmatmul.mubr.msk.bf16.gmra.mrb[12].mxu1 %vm118_vm1, %v1607_v30 }
  0x23   :  { %461 = vmatprep.mubr.bf16.mxu0 %v2231_v1  ;;  %502 = vmatprep.mubr.bf16.mxu1 %v2231_v1 }
  0x2a   :  { %462 = vmatmul.mubr.bf16.vlgmr.msra.gmra.mrb[16].mxu0 %v2231_v1  ;;  %503 = vmatmul.mubr.bf16.vlgmr.msra.gmra.mrb[16].mxu1 %v2231_v1 }
  0x2b   :  { %547 = vmatpush1.bf16.msra.mxu0 %v1821_v13  ;;  %588 = vmatpush1.bf16.msra.mxu1 %v1853_v18 }
  0x2c   :  { %548 = vmatprep.subr.bf16.mxu0 %v1827_v14  ;;  %589 = vmatprep.subr.bf16.mxu1 %v1859_v19 }
  0x2d   :  { %578 = vmatprep.mubr.bf16.mxu0 %v2231_v1  ;;  %619 = vmatprep.mubr.bf16.mxu1 %v2231_v1 }
  0x2f   :  { %549 = vmatpush1.bf16.msra.mxu0 %v1841_v16  ;;  %590 = vmatpush1.bf16.msra.mxu1 %v1876_v22 }
  0x30   :  { %550 = vmatprep.subr.bf16.mxu0 %v1848_v17  ;;  %591 = vmatprep.subr.bf16.mxu1 %v1886_v24 }
  0x33   :  { %551 = vmatpush1.bf16.msra.mxu0 %v1869_v21  ;;  %592 = vmatpush1.bf16.msra.mxu1 %v1902_v26 }
  0x34   :  { %552 = vmatprep.subr.bf16.mxu0 %v1881_v23  ;;  %593 = vmatprep.subr.bf16.mxu1 %v1909_v27 }
  0x37   :  { %553 = vmatpush1.bf16.msra.mxu0 %v1897_v25  ;;  %594 = vmatpush1.bf16.msra.mxu1 %v1919_v29 }
  0x38   :  { %663 = vmatprep.subr.bf16.mxu0 %v1816_v12  ;;  %704 = vmatprep.subr.bf16.mxu1 %v1834_v15 }
  0xdd   :  { %v1961_v39 = vpop.f32.mrb[0].mxu0  ;;  %v1963_v40 = vpop.f32.mrb[0].mxu1 }
  0xde   :  { %v180_v43 = vpop.f32.mrb[1].mxu0  ;;  %v253_v44 = vpop.f32.mrb[1].mxu1 }
  0xdf   :  { %v182_v46 = vpop.f32.mrb[2].mxu0  ;;  %v255_v47 = vpop.f32.mrb[2].mxu1 }
  0xe0   :  { %v1967_v48 = vadd.f32 %v182_v46, %v45_v42  ;;  %v184_v49 = vpop.f32.mrb[3].mxu0  ;;  %v1970_v50 = vadd.f32 %v255_v47, %v1959_v38  ;;  %v257_v51 = vpop.f32.mrb[3].mxu1 }
  0xe1   :  { %v1972_v52 = vadd.f32 %v184_v49, %v49_v45  ;;  %v1975_v53 = vadd.f32 %v257_v51, %v1965_v41 }
  0xe5   :  { %v188_v54 = vpop.f32.mrb[4].mxu0  ;;  %v261_v55 = vpop.f32.mrb[4].mxu1 }
  0xe6   :  { %v1977_v56 = vadd.f32 %v188_v54, %v45_v42  ;;  %v190_v57 = vpop.f32.mrb[5].mxu0  ;;  %v1980_v58 = vadd.f32 %v261_v55, %v1959_v38  ;;  %v263_v59 = vpop.f32.mrb[5].mxu1 }
  0xe7   :  { %v1982_v60 = vadd.f32 %v190_v57, %v49_v45  ;;  %v192_v61 = vpop.f32.mrb[6].mxu0  ;;  %v1985_v62 = vadd.f32 %v263_v59, %v1965_v41  ;;  %v265_v63 = vpop.f32.mrb[6].mxu1 }
  0xe8   :  { %v1987_v0 = vadd.f32 %v192_v61, %v45_v42  ;;  %v194_v2 = vpop.f32.mrb[7].mxu0  ;;  %v1990_v3 = vadd.f32 %v265_v63, %v1959_v38  ;;  %v267_v4 = vpop.f32.mrb[7].mxu1 }
  0xe9   :  { %v1992_v5 = vadd.f32 %v194_v2, %v49_v45  ;;  %v1995_v6 = vadd.f32 %v267_v4, %v1965_v41 }
  0xed   :  { %v198_v7 = vpop.f32.mrb[8].mxu0  ;;  %v271_v8 = vpop.f32.mrb[8].mxu1 }
  0xee   :  { %v1997_v9 = vadd.f32 %v198_v7, %v45_v42  ;;  %v200_v10 = vpop.f32.mrb[9].mxu0  ;;  %v2000_v11 = vadd.f32 %v271_v8, %v1959_v38  ;;  %v273_v20 = vpop.f32.mrb[9].mxu1 }
  0xef   :  { %v2002_v28 = vadd.f32 %v200_v10, %v49_v45  ;;  %v202_v30 = vpop.f32.mrb[10].mxu0  ;;  %v2005_v31 = vadd.f32 %v273_v20, %v1965_v41  ;;  %v275_v32 = vpop.f32.mrb[10].mxu1 }
  0xf0   :  { %v2007_v33 = vadd.f32 %v202_v30, %v45_v42  ;;  %v204_v34 = vpop.f32.mrb[11].mxu0  ;;  %v2010_v35 = vadd.f32 %v275_v32, %v1959_v38  ;;  %v277_v36 = vpop.f32.mrb[11].mxu1  ;;  %v179_v32 = vadd.f32 %v1961_v39, %v45_v42 }
  0xf1   :  { %v2012_v37 = vadd.f32 %v204_v34, %v49_v45  ;;  %v2015_v46 = vadd.f32 %v277_v36, %v1965_v41  ;;  %v252_v34 = vadd.f32 %v1963_v40, %v1959_v38  ;;  %v181_v36 = vadd.f32 %v180_v43, %v49_v45 }
  0xf5   :  { %v208_v47 = vpop.f32.mrb[12].mxu0  ;;  %v281_v49 = vpop.f32.mrb[12].mxu1 }
  0xf6   :  { %v2017_v51 = vadd.f32 %v208_v47, %v45_v42  ;;  %v210_v54 = vpop.f32.mrb[13].mxu0  ;;  %v2020_v55 = vadd.f32 %v281_v49, %v1959_v38  ;;  %v283_v57 = vpop.f32.mrb[13].mxu1  ;;  %v254_v47 = vadd.f32 %v253_v44, %v1965_v41 }
  0xf7   :  { %v2022_v59 = vadd.f32 %v210_v54, %v49_v45  ;;  %v212_v61 = vpop.f32.mrb[14].mxu0  ;;  %v2025_v63 = vadd.f32 %v283_v57, %v1965_v41  ;;  %v285_v2 = vpop.f32.mrb[14].mxu1 }
  0xf8   :  { %v2027_v4 = vadd.f32 %v212_v61, %v45_v42  ;;  %v214_v7 = vpop.f32.mrb[15].mxu0  ;;  %v2030_v8 = vadd.f32 %v285_v2, %v1959_v38  ;;  %v287_v10 = vpop.f32.mrb[15].mxu1 }
  0xf9   :  { %2233 = vst [vmem:[#allocation3_spill] sm:$0xff] %v2025_v63  ;;  %v2032_v20 = vadd.f32 %v214_v7, %v49_v45  ;;  %v2035_v30 = vadd.f32 %v287_v10, %v1965_v41 }
  0xfa   :  { %2234 = vst [vmem:[#allocation4_spill] sm:$0xff] %v2027_v4  ;;  %2235 = vst [vmem:[#allocation5_spill] sm:$0xff] %v2030_v8 }
  0xfb   :  { %2236 = vst [vmem:[#allocation6_spill] sm:$0xff] %v2032_v20  ;;  %2237 = vst [vmem:[#allocation7_spill] sm:$0xff] %v2035_v30 }
  0xfd   :  { %v463_v49 = vpop.f32.mrb[16].mxu0  ;;  %v504_v54 = vpop.f32.mrb[16].mxu1 }
  0xfe   :  { %v464_v57 = vadd.f32 %v463_v49, %v179_v32  ;;  %v505_v61 = vadd.f32 %v504_v54, %v252_v34  ;;  %v465_v2 = vpop.f32.mrb[17].mxu0  ;;  %v506_v1 = vpop.f32.mrb[17].mxu1  ;;  %v2238_v49 = vmov 0  }
  0xff   :  { %v466_v8 = vadd.f32 %v465_v2, %v181_v36  ;;  %v507_v7 = vadd.f32 %v506_v1, %v254_v47  ;;  %v467_v20 = vpop.f32.mrb[18].mxu0  ;;  %v508_v4 = vpop.f32.mrb[18].mxu1 }
 0x100   :  { %v1493_v10 = vmul.f32 -1.442695, %v464_v57  ;;  %v468_v30 = vpop.f32.mrb[19].mxu0  ;;  %v509_v63 = vpop.f32.mrb[19].mxu1 }
 0x101   :  { %v1494_v39 = vmul.f32 -1.442695, %v466_v8  ;;  %v1495_v38 = vmul.f32 -1.442695, %v507_v7 }
 0x102   :  { %1617 = vpow2.f32 %v1493_v10 }
 0x103   :  { %1619 = vpow2.f32 %v1494_v39 }
 0x104   :  { %1621 = vpow2.f32 %v1495_v38 }
 0x105   :  { %1623 = vtanh.f32 %v505_v61 }
 0x10c   :  { %v1618_v40 = vpop.eup %1617 }
 0x10d   :  { %v1620_v42 = vpop.eup %1619  ;;  %v514_v41 = vadd.f32 1.0, %v1618_v40 }
 0x10e   :  { %v520_v43 = vadd.f32 1.0, %v1620_v42  ;;  %v1622_v44 = vpop.eup %1621 }
 0x10f   :  { %1625 = vrcp.f32 %v514_v41  ;;  %v1624_v45 = vpop.eup %1623  ;;  %v527_v32 = vadd.f32 1.0, %v1622_v44 }
 0x110   :  { %1627 = vrcp.f32 %v520_v43 }
 0x111   :  { %1629 = vrcp.f32 %v527_v32 }
 0x119   :  { %v1626_v1 = vpop.eup %1625 }
 0x11a   :  { %v1628_v20 = vpop.eup %1627  ;;  %v531_v4 = vmul.f32 %v1626_v1, %v1624_v45 }
 0x11b   :  { %v530_v30 = vmul.f32 0.0, %v1628_v20  ;;  %v1630_v8 = vpop.eup %1629 }
 0x11d   :  { %v532_v63 = vadd.f32 %v531_v4, %v530_v30 }
 0x11f   :  { %1631 = vtanh.f32 %v532_v63 }
 0x129   :  { %v1632_v34 = vpop.eup %1631 }
 0x12a   :  { %v534_v36 = vmul.f32 %v1632_v34, %v1630_v8 }
 0x12c   :  { %v542_v47 = vpack.c.bf16 %v534_v36, %v534_v36 }
 0x12e   :  { %1496 = vmatmul.mubr.msk.bf16.vlgmr.msra.gmra.mrb[20].mxu0 %vm425_vm2, %v542_v47  ;;  %1497 = vmatmul.mubr.msk.bf16.vlgmr.msra.gmra.mrb[20].mxu1 %vm425_vm2, %v542_v47 }
 0x12f   :  { %664 = vmatpush1.bf16.msra.mxu0 %v1821_v13  ;;  %705 = vmatpush1.bf16.msra.mxu1 %v1853_v18 }
 0x130   :  { %665 = vmatprep.subr.bf16.mxu0 %v1827_v14  ;;  %706 = vmatprep.subr.bf16.mxu1 %v1859_v19 }
 0x131   :  { %695 = vmatprep.mubr.bf16.mxu0 %v2238_v49  ;;  %736 = vmatprep.mubr.bf16.mxu1 %v2238_v49 }
 0x133   :  { %666 = vmatpush1.bf16.msra.mxu0 %v1841_v16  ;;  %707 = vmatpush1.bf16.msra.mxu1 %v1876_v22 }
 0x134   :  { %667 = vmatprep.subr.bf16.mxu0 %v1848_v17  ;;  %708 = vmatprep.subr.bf16.mxu1 %v1886_v24 }
 0x137   :  { %668 = vmatpush1.bf16.msra.mxu0 %v1869_v21  ;;  %709 = vmatpush1.bf16.msra.mxu1 %v1902_v26 }
 0x138   :  { %669 = vmatprep.subr.bf16.mxu0 %v1881_v23  ;;  %710 = vmatprep.subr.bf16.mxu1 %v1909_v27 }
 0x13b   :  { %670 = vmatpush1.bf16.msra.mxu0 %v1897_v25  ;;  %711 = vmatpush1.bf16.msra.mxu1 %v1919_v29 }
 0x13c   :  { %780 = vmatprep.subr.bf16.mxu0 %v1816_v12  ;;  %821 = vmatprep.subr.bf16.mxu1 %v1834_v15 }
 0x201   :  { %v580_v54 = vpop.f32.mrb[20].mxu0  ;;  %v621_v57 = vpop.f32.mrb[20].mxu1 }
 0x202   :  { %v581_v61 = vadd.f32 %v580_v54, %v1967_v48  ;;  %v622_v2 = vadd.f32 %v621_v57, %v1970_v50  ;;  %v582_v7 = vpop.f32.mrb[21].mxu0  ;;  %v623_v10 = vpop.f32.mrb[21].mxu1 }
 0x203   :  { %v583_v39 = vadd.f32 %v582_v7, %v1972_v52  ;;  %v624_v38 = vadd.f32 %v623_v10, %v1975_v53  ;;  %v584_v40 = vpop.f32.mrb[22].mxu0  ;;  %v625_v42 = vpop.f32.mrb[22].mxu1 }
 0x204   :  { %v1498_v41 = vmul.f32 -1.442695, %v581_v61  ;;  %v585_v43 = vpop.f32.mrb[23].mxu0  ;;  %v626_v44 = vpop.f32.mrb[23].mxu1 }
 0x205   :  { %v1499_v45 = vmul.f32 -1.442695, %v583_v39  ;;  %v1500_v1 = vmul.f32 -1.442695, %v624_v38 }
 0x206   :  { %1633 = vpow2.f32 %v1498_v41 }
 0x207   :  { %1635 = vpow2.f32 %v1499_v45 }
 0x208   :  { %1637 = vpow2.f32 %v1500_v1 }
 0x209   :  { %1639 = vtanh.f32 %v622_v2 }
 0x210   :  { %v1634_v20 = vpop.eup %1633 }
 0x211   :  { %v1636_v4 = vpop.eup %1635  ;;  %v631_v48 = vadd.f32 1.0, %v1634_v20 }
 0x212   :  { %v637_v50 = vadd.f32 1.0, %v1636_v4  ;;  %v1638_v52 = vpop.eup %1637 }
 0x213   :  { %1641 = vrcp.f32 %v631_v48  ;;  %v1640_v32 = vpop.eup %1639  ;;  %v644_v34 = vadd.f32 1.0, %v1638_v52 }
 0x214   :  { %1643 = vrcp.f32 %v637_v50 }
 0x215   :  { %1645 = vrcp.f32 %v644_v34 }
 0x21d   :  { %v1642_v53 = vpop.eup %1641 }
 0x21e   :  { %v1644_v30 = vpop.eup %1643  ;;  %v648_v8 = vmul.f32 %v1642_v53, %v1640_v32 }
 0x21f   :  { %v647_v36 = vmul.f32 %v1644_v30, %v532_v63  ;;  %v1646_v54 = vpop.eup %1645 }
 0x221   :  { %v649_v47 = vadd.f32 %v648_v8, %v647_v36 }
 0x223   :  { %1647 = vtanh.f32 %v649_v47 }
 0x22d   :  { %v1648_v57 = vpop.eup %1647 }
 0x22e   :  { %v651_v61 = vmul.f32 %v1648_v57, %v1646_v54 }
 0x230   :  { %v659_v7 = vpack.c.bf16 %v651_v61, %v651_v61 }
 0x232   :  { %1501 = vmatmul.mubr.msk.bf16.vlgmr.msra.gmra.mrb[24].mxu0 %vm425_vm2, %v659_v7  ;;  %1502 = vmatmul.mubr.msk.bf16.vlgmr.msra.gmra.mrb[24].mxu1 %vm425_vm2, %v659_v7 }
 0x233   :  { %781 = vmatpush1.bf16.msra.mxu0 %v1821_v13  ;;  %822 = vmatpush1.bf16.msra.mxu1 %v1853_v18 }
 0x234   :  { %782 = vmatprep.subr.bf16.mxu0 %v1827_v14  ;;  %823 = vmatprep.subr.bf16.mxu1 %v1859_v19 }
 0x235   :  { %812 = vmatprep.mubr.bf16.mxu0 %v2238_v49  ;;  %853 = vmatprep.mubr.bf16.mxu1 %v2238_v49 }
 0x237   :  { %783 = vmatpush1.bf16.msra.mxu0 %v1841_v16  ;;  %824 = vmatpush1.bf16.msra.mxu1 %v1876_v22 }
 0x238   :  { %784 = vmatprep.subr.bf16.mxu0 %v1848_v17  ;;  %825 = vmatprep.subr.bf16.mxu1 %v1886_v24 }
 0x23b   :  { %785 = vmatpush1.bf16.msra.mxu0 %v1869_v21  ;;  %826 = vmatpush1.bf16.msra.mxu1 %v1902_v26 }
 0x23c   :  { %786 = vmatprep.subr.bf16.mxu0 %v1881_v23  ;;  %827 = vmatprep.subr.bf16.mxu1 %v1909_v27 }
 0x23f   :  { %787 = vmatpush1.bf16.msra.mxu0 %v1897_v25  ;;  %828 = vmatpush1.bf16.msra.mxu1 %v1919_v29 }
 0x240   :  { %897 = vmatprep.subr.bf16.mxu0 %v1816_v12  ;;  %938 = vmatprep.subr.bf16.mxu1 %v1834_v15 }
 0x305   :  { %v697_v63 = vpop.f32.mrb[24].mxu0  ;;  %v738_v2 = vpop.f32.mrb[24].mxu1 }
 0x306   :  { %v698_v10 = vadd.f32 %v697_v63, %v1977_v56  ;;  %v739_v39 = vadd.f32 %v738_v2, %v1980_v58  ;;  %v699_v38 = vpop.f32.mrb[25].mxu0  ;;  %v740_v40 = vpop.f32.mrb[25].mxu1 }
 0x307   :  { %v700_v42 = vadd.f32 %v699_v38, %v1982_v60  ;;  %v741_v41 = vadd.f32 %v740_v40, %v1985_v62  ;;  %v701_v43 = vpop.f32.mrb[26].mxu0  ;;  %v742_v44 = vpop.f32.mrb[26].mxu1 }
 0x308   :  { %v1503_v45 = vmul.f32 -1.442695, %v698_v10  ;;  %v702_v1 = vpop.f32.mrb[27].mxu0  ;;  %v743_v20 = vpop.f32.mrb[27].mxu1 }
 0x309   :  { %v1504_v4 = vmul.f32 -1.442695, %v700_v42  ;;  %v1505_v48 = vmul.f32 -1.442695, %v741_v41 }
 0x30a   :  { %1649 = vpow2.f32 %v1503_v45 }
 0x30b   :  { %1651 = vpow2.f32 %v1504_v4 }
 0x30c   :  { %1653 = vpow2.f32 %v1505_v48 }
 0x30d   :  { %1655 = vtanh.f32 %v739_v39 }
 0x314   :  { %v1650_v50 = vpop.eup %1649 }
 0x315   :  { %v1652_v52 = vpop.eup %1651  ;;  %v748_v56 = vadd.f32 1.0, %v1650_v50 }
 0x316   :  { %v754_v58 = vadd.f32 1.0, %v1652_v52  ;;  %v1654_v60 = vpop.eup %1653 }
 0x317   :  { %1657 = vrcp.f32 %v748_v56  ;;  %v1656_v32 = vpop.eup %1655  ;;  %v761_v8 = vadd.f32 1.0, %v1654_v60 }
 0x318   :  { %1659 = vrcp.f32 %v754_v58 }
 0x319   :  { %1661 = vrcp.f32 %v761_v8 }
 0x321   :  { %v1658_v62 = vpop.eup %1657 }
 0x322   :  { %v1660_v53 = vpop.eup %1659  ;;  %v765_v30 = vmul.f32 %v1658_v62, %v1656_v32 }
 0x323   :  { %v764_v34 = vmul.f32 %v1660_v53, %v649_v47  ;;  %v1662_v54 = vpop.eup %1661 }
 0x325   :  { %v766_v36 = vadd.f32 %v765_v30, %v764_v34 }
 0x327   :  { %1663 = vtanh.f32 %v766_v36 }
 0x331   :  { %v1664_v57 = vpop.eup %1663 }
 0x332   :  { %v768_v61 = vmul.f32 %v1664_v57, %v1662_v54 }
 0x334   :  { %v776_v7 = vpack.c.bf16 %v768_v61, %v768_v61 }
 0x336   :  { %1506 = vmatmul.mubr.msk.bf16.vlgmr.msra.gmra.mrb[28].mxu0 %vm425_vm2, %v776_v7  ;;  %1507 = vmatmul.mubr.msk.bf16.vlgmr.msra.gmra.mrb[28].mxu1 %vm425_vm2, %v776_v7 }
 0x337   :  { %898 = vmatpush1.bf16.msra.mxu0 %v1821_v13  ;;  %939 = vmatpush1.bf16.msra.mxu1 %v1853_v18 }
 0x338   :  { %899 = vmatprep.subr.bf16.mxu0 %v1827_v14  ;;  %940 = vmatprep.subr.bf16.mxu1 %v1859_v19 }
 0x339   :  { %929 = vmatprep.mubr.bf16.mxu0 %v2238_v49  ;;  %970 = vmatprep.mubr.bf16.mxu1 %v2238_v49 }
 0x33b   :  { %900 = vmatpush1.bf16.msra.mxu0 %v1841_v16  ;;  %941 = vmatpush1.bf16.msra.mxu1 %v1876_v22 }
 0x33c   :  { %901 = vmatprep.subr.bf16.mxu0 %v1848_v17  ;;  %942 = vmatprep.subr.bf16.mxu1 %v1886_v24 }
 0x33f   :  { %902 = vmatpush1.bf16.msra.mxu0 %v1869_v21  ;;  %943 = vmatpush1.bf16.msra.mxu1 %v1902_v26 }
 0x340   :  { %903 = vmatprep.subr.bf16.mxu0 %v1881_v23  ;;  %944 = vmatprep.subr.bf16.mxu1 %v1909_v27 }
 0x343   :  { %904 = vmatpush1.bf16.msra.mxu0 %v1897_v25  ;;  %945 = vmatpush1.bf16.msra.mxu1 %v1919_v29 }
 0x344   :  { %1014 = vmatprep.subr.bf16.mxu0 %v1816_v12  ;;  %1055 = vmatprep.subr.bf16.mxu1 %v1834_v15 }
 0x409   :  { %v814_v47 = vpop.f32.mrb[28].mxu0  ;;  %v855_v63 = vpop.f32.mrb[28].mxu1 }
 0x40a   :  { %v815_v2 = vadd.f32 %v814_v47, %v1987_v0  ;;  %v856_v10 = vadd.f32 %v855_v63, %v1990_v3  ;;  %v816_v39 = vpop.f32.mrb[29].mxu0  ;;  %v857_v38 = vpop.f32.mrb[29].mxu1 }
 0x40b   :  { %v817_v40 = vadd.f32 %v816_v39, %v1992_v5  ;;  %v858_v42 = vadd.f32 %v857_v38, %v1995_v6  ;;  %v818_v41 = vpop.f32.mrb[30].mxu0  ;;  %v859_v43 = vpop.f32.mrb[30].mxu1 }
 0x40c   :  { %v1508_v44 = vmul.f32 -1.442695, %v815_v2  ;;  %v819_v45 = vpop.f32.mrb[31].mxu0  ;;  %v860_v1 = vpop.f32.mrb[31].mxu1 }
 0x40d   :  { %v1509_v20 = vmul.f32 -1.442695, %v817_v40  ;;  %v1510_v4 = vmul.f32 -1.442695, %v858_v42 }
 0x40e   :  { %1665 = vpow2.f32 %v1508_v44 }
 0x40f   :  { %1667 = vpow2.f32 %v1509_v20 }
 0x410   :  { %1669 = vpow2.f32 %v1510_v4 }
 0x411   :  { %1671 = vtanh.f32 %v856_v10 }
 0x418   :  { %v1666_v48 = vpop.eup %1665 }
 0x419   :  { %v1668_v50 = vpop.eup %1667  ;;  %v865_v0 = vadd.f32 1.0, %v1666_v48 }
 0x41a   :  { %v871_v3 = vadd.f32 1.0, %v1668_v50  ;;  %v1670_v5 = vpop.eup %1669 }
 0x41b   :  { %1673 = vrcp.f32 %v865_v0  ;;  %v1672_v52 = vpop.eup %1671  ;;  %v878_v60 = vadd.f32 1.0, %v1670_v5 }
 0x41c   :  { %1675 = vrcp.f32 %v871_v3 }
 0x41d   :  { %1677 = vrcp.f32 %v878_v60 }
 0x425   :  { %v1674_v6 = vpop.eup %1673 }
 0x426   :  { %v1676_v56 = vpop.eup %1675  ;;  %v882_v58 = vmul.f32 %v1674_v6, %v1672_v52 }
 0x427   :  { %v881_v32 = vmul.f32 %v1676_v56, %v766_v36  ;;  %v1678_v53 = vpop.eup %1677 }
 0x429   :  { %v883_v62 = vadd.f32 %v882_v58, %v881_v32 }
 0x42b   :  { %1679 = vtanh.f32 %v883_v62 }
 0x435   :  { %v1680_v30 = vpop.eup %1679 }
 0x436   :  { %v885_v8 = vmul.f32 %v1680_v30, %v1678_v53 }
 0x438   :  { %v893_v34 = vpack.c.bf16 %v885_v8, %v885_v8 }
 0x43a   :  { %1511 = vmatmul.mubr.msk.bf16.vlgmr.msra.gmra.mrb[32].mxu0 %vm425_vm2, %v893_v34  ;;  %1512 = vmatmul.mubr.msk.bf16.vlgmr.msra.gmra.mrb[32].mxu1 %vm425_vm2, %v893_v34 }
 0x43b   :  { %1015 = vmatpush1.bf16.msra.mxu0 %v1821_v13  ;;  %1056 = vmatpush1.bf16.msra.mxu1 %v1853_v18 }
 0x43c   :  { %1016 = vmatprep.subr.bf16.mxu0 %v1827_v14  ;;  %1057 = vmatprep.subr.bf16.mxu1 %v1859_v19 }
 0x43d   :  { %1046 = vmatprep.mubr.bf16.mxu0 %v2238_v49  ;;  %1087 = vmatprep.mubr.bf16.mxu1 %v2238_v49 }
 0x43f   :  { %1017 = vmatpush1.bf16.msra.mxu0 %v1841_v16  ;;  %1058 = vmatpush1.bf16.msra.mxu1 %v1876_v22 }
 0x440   :  { %1018 = vmatprep.subr.bf16.mxu0 %v1848_v17  ;;  %1059 = vmatprep.subr.bf16.mxu1 %v1886_v24 }
 0x443   :  { %1019 = vmatpush1.bf16.msra.mxu0 %v1869_v21  ;;  %1060 = vmatpush1.bf16.msra.mxu1 %v1902_v26 }
 0x444   :  { %1020 = vmatprep.subr.bf16.mxu0 %v1881_v23  ;;  %1061 = vmatprep.subr.bf16.mxu1 %v1909_v27 }
 0x447   :  { %1021 = vmatpush1.bf16.msra.mxu0 %v1897_v25  ;;  %1062 = vmatpush1.bf16.msra.mxu1 %v1919_v29 }
 0x448   :  { %1131 = vmatprep.subr.bf16.mxu0 %v1816_v12  ;;  %1172 = vmatprep.subr.bf16.mxu1 %v1834_v15 }
 0x50d   :  { %v931_v36 = vpop.f32.mrb[32].mxu0  ;;  %v972_v54 = vpop.f32.mrb[32].mxu1 }
 0x50e   :  { %v932_v57 = vadd.f32 %v931_v36, %v1997_v9  ;;  %v973_v61 = vadd.f32 %v972_v54, %v2000_v11  ;;  %v933_v7 = vpop.f32.mrb[33].mxu0  ;;  %v974_v47 = vpop.f32.mrb[33].mxu1 }
 0x50f   :  { %v934_v63 = vadd.f32 %v933_v7, %v2002_v28  ;;  %v975_v2 = vadd.f32 %v974_v47, %v2005_v31  ;;  %v935_v10 = vpop.f32.mrb[34].mxu0  ;;  %v976_v39 = vpop.f32.mrb[34].mxu1 }
 0x510   :  { %v1513_v38 = vmul.f32 -1.442695, %v932_v57  ;;  %v936_v40 = vpop.f32.mrb[35].mxu0  ;;  %v977_v42 = vpop.f32.mrb[35].mxu1 }
 0x511   :  { %v1514_v41 = vmul.f32 -1.442695, %v934_v63  ;;  %v1515_v43 = vmul.f32 -1.442695, %v975_v2 }
 0x512   :  { %1681 = vpow2.f32 %v1513_v38 }
 0x513   :  { %1683 = vpow2.f32 %v1514_v41 }
 0x514   :  { %1685 = vpow2.f32 %v1515_v43 }
 0x515   :  { %1687 = vtanh.f32 %v973_v61 }
 0x51c   :  { %v1682_v44 = vpop.eup %1681 }
 0x51d   :  { %v1684_v45 = vpop.eup %1683  ;;  %v982_v9 = vadd.f32 1.0, %v1682_v44 }
 0x51e   :  { %v988_v11 = vadd.f32 1.0, %v1684_v45  ;;  %v1686_v28 = vpop.eup %1685 }
 0x51f   :  { %1689 = vrcp.f32 %v982_v9  ;;  %v1688_v1 = vpop.eup %1687  ;;  %v995_v48 = vadd.f32 1.0, %v1686_v28 }
 0x520   :  { %1691 = vrcp.f32 %v988_v11 }
 0x521   :  { %1693 = vrcp.f32 %v995_v48 }
 0x529   :  { %v1690_v31 = vpop.eup %1689 }
 0x52a   :  { %v1692_v20 = vpop.eup %1691  ;;  %v999_v4 = vmul.f32 %v1690_v31, %v1688_v1 }
 0x52b   :  { %v998_v50 = vmul.f32 %v1692_v20, %v883_v62  ;;  %v1694_v3 = vpop.eup %1693 }
 0x52d   :  { %v1000_v0 = vadd.f32 %v999_v4, %v998_v50 }
 0x52f   :  { %1695 = vtanh.f32 %v1000_v0 }
 0x539   :  { %v1696_v5 = vpop.eup %1695 }
 0x53a   :  { %v1002_v52 = vmul.f32 %v1696_v5, %v1694_v3 }
 0x53c   :  { %v1010_v6 = vpack.c.bf16 %v1002_v52, %v1002_v52 }
 0x53e   :  { %1516 = vmatmul.mubr.msk.bf16.vlgmr.msra.gmra.mrb[36].mxu0 %vm425_vm2, %v1010_v6  ;;  %1517 = vmatmul.mubr.msk.bf16.vlgmr.msra.gmra.mrb[36].mxu1 %vm425_vm2, %v1010_v6  ;;  %v1354_v6 = vld [vmem:[%s2228_s4] sm:$0xff] }
 0x53f   :  { %1132 = vmatpush1.bf16.msra.mxu0 %v1821_v13  ;;  %1173 = vmatpush1.bf16.msra.mxu1 %v1853_v18 }
 0x540   :  { %1133 = vmatprep.subr.bf16.mxu0 %v1827_v14  ;;  %1174 = vmatprep.subr.bf16.mxu1 %v1859_v19 }
 0x541   :  { %1163 = vmatprep.mubr.bf16.mxu0 %v2238_v49  ;;  %1204 = vmatprep.mubr.bf16.mxu1 %v2238_v49 }
 0x543   :  { %1134 = vmatpush1.bf16.msra.mxu0 %v1841_v16  ;;  %1175 = vmatpush1.bf16.msra.mxu1 %v1876_v22 }
 0x544   :  { %1135 = vmatprep.subr.bf16.mxu0 %v1848_v17  ;;  %1176 = vmatprep.subr.bf16.mxu1 %v1886_v24 }
 0x547   :  { %1136 = vmatpush1.bf16.msra.mxu0 %v1869_v21  ;;  %1177 = vmatpush1.bf16.msra.mxu1 %v1902_v26 }
 0x548   :  { %1137 = vmatprep.subr.bf16.mxu0 %v1881_v23  ;;  %1178 = vmatprep.subr.bf16.mxu1 %v1909_v27 }
 0x54b   :  { %1138 = vmatpush1.bf16.msra.mxu0 %v1897_v25  ;;  %1179 = vmatpush1.bf16.msra.mxu1 %v1919_v29 }
 0x54c   :  { %1248 = vmatprep.subr.bf16.mxu0 %v1816_v12  ;;  %1289 = vmatprep.subr.bf16.mxu1 %v1834_v15 }
 0x611   :  { %v1048_v56 = vpop.f32.mrb[36].mxu0  ;;  %v1089_v58 = vpop.f32.mrb[36].mxu1 }
 0x612   :  { %v1049_v60 = vadd.f32 %v1048_v56, %v2007_v33  ;;  %v1090_v32 = vadd.f32 %v1089_v58, %v2010_v35  ;;  %v1050_v62 = vpop.f32.mrb[37].mxu0  ;;  %v1091_v53 = vpop.f32.mrb[37].mxu1  ;;  %v1355_v56 = vld [vmem:[%s2228_s4 + $0x8] sm:$0xff] }
 0x613   :  { %v1051_v30 = vadd.f32 %v1050_v62, %v2012_v37  ;;  %v1092_v8 = vadd.f32 %v1091_v53, %v2015_v46  ;;  %v1052_v34 = vpop.f32.mrb[38].mxu0  ;;  %v1093_v36 = vpop.f32.mrb[38].mxu1  ;;  %v1562_v58 = vpack.c.bf16 %v1355_v56, %v1354_v6  ;;  %v1357_v62 = vld [vmem:[%s2228_s4 + $0x18] sm:$0xff]  ;;  %v1358_v53 = vld [vmem:[%s2228_s4 + $0x20] sm:$0xff] }
 0x614   :  { %v1518_v54 = vmul.f32 -1.442695, %v1049_v60  ;;  %v1053_v57 = vpop.f32.mrb[39].mxu0  ;;  %v1094_v61 = vpop.f32.mrb[39].mxu1  ;;  %v1746_v60 = vmov 0.0|0.0   ;;  %v1748_v34 = vmov 0.0  }
 0x615   :  { %v1519_v12 = vmul.f32 -1.442695, %v1051_v30  ;;  %v1520_v15 = vmul.f32 -1.442695, %v1092_v8  ;;  %v1359_v8 = vld [vmem:[%s2228_s4 + $0x28] sm:$0xff]  ;;  %v1361_v57 = vld [vmem:[%s2228_s4 + $0x38] sm:$0xff] }
 0x616   :  { %1697 = vpow2.f32 %v1518_v54  ;;  %v1568_v36 = vpack.c.bf16 %v1359_v8, %v1358_v53  ;;  %v1360_v54 = vld [vmem:[%s2228_s4 + $0x30] sm:$0xff] }
 0x617   :  { %1699 = vpow2.f32 %v1519_v12  ;;  %v1571_v61 = vpack.c.bf16 %v1361_v57, %v1360_v54 }
 0x618   :  { %1701 = vpow2.f32 %v1520_v15 }
 0x619   :  { %1703 = vtanh.f32 %v1090_v32  ;;  %v1356_v32 = vld [vmem:[%s2228_s4 + $0x10] sm:$0xff] }
 0x61a   :  { %v1565_v30 = vpack.c.bf16 %v1357_v62, %v1356_v32 }
 0x620   :  { %v1698_v7 = vpop.eup %1697 }
 0x621   :  { %v1700_v47 = vpop.eup %1699  ;;  %v1099_v33 = vadd.f32 1.0, %v1698_v7  ;;  %v2240_v7 = vld [vmem:[#allocation4_spill] sm:$0xff] }
 0x622   :  { %v1105_v35 = vadd.f32 1.0, %v1700_v47  ;;  %v1702_v37 = vpop.eup %1701 }
 0x623   :  { %1705 = vrcp.f32 %v1099_v33  ;;  %v1704_v63 = vpop.eup %1703  ;;  %v1112_v39 = vadd.f32 1.0, %v1702_v37  ;;  %v2241_v33 = vld [vmem:[#allocation5_spill] sm:$0xff] }
 0x624   :  { %1707 = vrcp.f32 %v1105_v35 }
 0x625   :  { %1709 = vrcp.f32 %v1112_v39 }
 0x62d   :  { %v1706_v46 = vpop.eup %1705 }
 0x62e   :  { %v1708_v2 = vpop.eup %1707  ;;  %v1116_v10 = vmul.f32 %v1706_v46, %v1704_v63  ;;  %v2242_v46 = vld [vmem:[#allocation6_spill] sm:$0xff] }
 0x62f   :  { %v1115_v38 = vmul.f32 %v1708_v2, %v1000_v0  ;;  %v1710_v42 = vpop.eup %1709 }
 0x631   :  { %v1117_v40 = vadd.f32 %v1116_v10, %v1115_v38  ;;  %v2243_v10 = vld [vmem:[#allocation7_spill] sm:$0xff] }
 0x633   :  { %1711 = vtanh.f32 %v1117_v40 }
 0x63d   :  { %v1712_v41 = vpop.eup %1711 }
 0x63e   :  { %v1119_v43 = vmul.f32 %v1712_v41, %v1710_v42 }
 0x640   :  { %v1127_v44 = vpack.c.bf16 %v1119_v43, %v1119_v43 }
 0x642   :  { %1521 = vmatmul.mubr.msk.bf16.vlgmr.msra.gmra.mrb[40].mxu0 %vm425_vm2, %v1127_v44  ;;  %1522 = vmatmul.mubr.msk.bf16.vlgmr.msra.gmra.mrb[40].mxu1 %vm425_vm2, %v1127_v44 }
 0x643   :  { %1249 = vmatpush1.bf16.msra.mxu0 %v1821_v13  ;;  %1290 = vmatpush1.bf16.msra.mxu1 %v1853_v18 }
 0x644   :  { %1250 = vmatprep.subr.bf16.mxu0 %v1827_v14  ;;  %1291 = vmatprep.subr.bf16.mxu1 %v1859_v19 }
 0x645   :  { %1280 = vmatprep.mubr.bf16.mxu0 %v2238_v49  ;;  %1321 = vmatprep.mubr.bf16.mxu1 %v2238_v49 }
 0x647   :  { %1251 = vmatpush1.bf16.msra.mxu0 %v1841_v16  ;;  %1292 = vmatpush1.bf16.msra.mxu1 %v1876_v22  ;;  %v2239_v22 = vld [vmem:[#allocation3_spill] sm:$0xff] }
 0x648   :  { %1252 = vmatprep.subr.bf16.mxu0 %v1848_v17  ;;  %1293 = vmatprep.subr.bf16.mxu1 %v1886_v24 }
 0x64b   :  { %1253 = vmatpush1.bf16.msra.mxu0 %v1869_v21  ;;  %1294 = vmatpush1.bf16.msra.mxu1 %v1902_v26 }
 0x64c   :  { %1254 = vmatprep.subr.bf16.mxu0 %v1881_v23  ;;  %1295 = vmatprep.subr.bf16.mxu1 %v1909_v27 }
 0x64f   :  { %1255 = vmatpush1.bf16.msra.mxu0 %v1897_v25  ;;  %1296 = vmatpush1.bf16.msra.mxu1 %v1919_v29 }
 0x650   :  { %1561 = vmatprep.subr.bf16.mxu0 %v1746_v60 }
 0x715   :  { %v1165_v13 = vpop.f32.mrb[40].mxu0  ;;  %v1206_v14 = vpop.f32.mrb[40].mxu1 }
 0x716   :  { %v1166_v16 = vadd.f32 %v1165_v13, %v2017_v51  ;;  %v1207_v17 = vadd.f32 %v1206_v14, %v2020_v55  ;;  %v1167_v18 = vpop.f32.mrb[41].mxu0  ;;  %v1208_v19 = vpop.f32.mrb[41].mxu1 }
 0x717   :  { %v1168_v21 = vadd.f32 %v1167_v18, %v2022_v59  ;;  %v1209_v24 = vadd.f32 %v1208_v19, %v2239_v22  ;;  %v1169_v26 = vpop.f32.mrb[42].mxu0  ;;  %v1210_v23 = vpop.f32.mrb[42].mxu1 }
 0x718   :  { %v1523_v49 = vmul.f32 -1.442695, %v1166_v16  ;;  %v1170_v27 = vpop.f32.mrb[43].mxu0  ;;  %v1211_v45 = vpop.f32.mrb[43].mxu1 }
 0x719   :  { %v1524_v25 = vmul.f32 -1.442695, %v1168_v21  ;;  %v1525_v29 = vmul.f32 -1.442695, %v1209_v24 }
 0x71a   :  { %1713 = vpow2.f32 %v1523_v49 }
 0x71b   :  { %1715 = vpow2.f32 %v1524_v25 }
 0x71c   :  { %1717 = vpow2.f32 %v1525_v29 }
 0x71d   :  { %1719 = vtanh.f32 %v1207_v17 }
 0x724   :  { %v1714_v9 = vpop.eup %1713 }
 0x725   :  { %v1716_v11 = vpop.eup %1715  ;;  %v1216_v51 = vadd.f32 1.0, %v1714_v9  ;;  %v1531_v9 = vld [vmem:[%s2229_s5] ss:$0 sm:$0xff] }
 0x726   :  { %v1222_v55 = vadd.f32 1.0, %v1716_v11  ;;  %v1718_v59 = vpop.eup %1717 }
 0x727   :  { %1721 = vrcp.f32 %v1216_v51  ;;  %v1720_v28 = vpop.eup %1719  ;;  %v1229_v4 = vadd.f32 1.0, %v1718_v59 }
 0x728   :  { %1723 = vrcp.f32 %v1222_v55 }
 0x729   :  { %1725 = vrcp.f32 %v1229_v4 }
 0x731   :  { %v1722_v1 = vpop.eup %1721 }
 0x732   :  { %v1724_v31 = vpop.eup %1723  ;;  %v1233_v20 = vmul.f32 %v1722_v1, %v1720_v28 }
 0x733   :  { %v1232_v48 = vmul.f32 %v1724_v31, %v1117_v40  ;;  %v1726_v0 = vpop.eup %1725 }
 0x735   :  { %v2183_v50 = vadd.f32 %v1233_v20, %v1232_v48 }
 0x737   :  { %1727 = vtanh.f32 %v2183_v50 }
 0x741   :  { %v1728_v3 = vpop.eup %1727 }
 0x742   :  { %v1236_v5 = vmul.f32 %v1728_v3, %v1726_v0 }
 0x744   :  { %v1244_v52 = vpack.c.bf16 %v1236_v5, %v1236_v5 }
 0x746   :  { %1526 = vmatmul.mubr.msk.bf16.vlgmr.msra.gmra.mrb[44].mxu0 %vm425_vm2, %v1244_v52  ;;  %1527 = vmatmul.mubr.msk.bf16.vlgmr.msra.gmra.mrb[44].mxu1 %vm425_vm2, %v1244_v52 }
 0x747   :  { %1563 = vmatpush3.bf16.msra.mxu0 %v1562_v58  ;;  %1558 = vmatprep.mubr.msk.f32.mxu0 %vm1747_vm3, %v1748_v34 }
 0x748   :  { %1564 = vmatprep.subr.bf16.mxu0 %v1746_v60 }
 0x74b   :  { %1566 = vmatpush3.bf16.msra.mxu0 %v1565_v30 }
 0x74c   :  { %1567 = vmatprep.subr.bf16.mxu0 %v1746_v60 }
 0x74f   :  { %1569 = vmatpush3.bf16.msra.mxu0 %v1568_v36 }
 0x750   :  { %1570 = vmatprep.subr.bf16.mxu0 %v1746_v60 }
 0x753   :  { %1572 = vmatpush3.bf16.msra.mxu0 %v1571_v61 }
 0x819   :  { %v1282_v12 = vpop.f32.mrb[44].mxu0  ;;  %v1323_v15 = vpop.f32.mrb[44].mxu1 }
 0x81a   :  { %v1283_v47 = vadd.f32 %v1282_v12, %v2240_v7  ;;  %v1324_v35 = vadd.f32 %v1323_v15, %v2241_v33  ;;  %v1284_v37 = vpop.f32.mrb[45].mxu0  ;;  %v1325_v63 = vpop.f32.mrb[45].mxu1 }
 0x81b   :  { %v1285_v2 = vadd.f32 %v1284_v37, %v2242_v46  ;;  %v1326_v39 = vadd.f32 %v1325_v63, %v2243_v10  ;;  %v1286_v38 = vpop.f32.mrb[46].mxu0  ;;  %v1327_v40 = vpop.f32.mrb[46].mxu1 }
 0x81c   :  { %v1528_v42 = vmul.f32 -1.442695, %v1283_v47  ;;  %v1287_v41 = vpop.f32.mrb[47].mxu0  ;;  %v1328_v43 = vpop.f32.mrb[47].mxu1 }
 0x81d   :  { %v1529_v44 = vmul.f32 -1.442695, %v1285_v2  ;;  %v1530_v13 = vmul.f32 -1.442695, %v1326_v39 }
 0x81e   :  { %1729 = vpow2.f32 %v1528_v42 }
 0x81f   :  { %1731 = vpow2.f32 %v1529_v44 }
 0x820   :  { %1733 = vpow2.f32 %v1530_v13 }
 0x821   :  { %1735 = vtanh.f32 %v1324_v35 }
 0x828   :  { %v1730_v14 = vpop.eup %1729 }
 0x829   :  { %v1732_v16 = vpop.eup %1731  ;;  %v1333_v17 = vadd.f32 1.0, %v1730_v14 }
 0x82a   :  { %v1339_v18 = vadd.f32 1.0, %v1732_v16  ;;  %v1734_v19 = vpop.eup %1733 }
 0x82b   :  { %1737 = vrcp.f32 %v1333_v17  ;;  %v1736_v21 = vpop.eup %1735  ;;  %v1346_v23 = vadd.f32 1.0, %v1734_v19 }
 0x82c   :  { %1739 = vrcp.f32 %v1339_v18 }
 0x82d   :  { %1741 = vrcp.f32 %v1346_v23 }
 0x835   :  { %v1738_v22 = vpop.eup %1737 }
 0x836   :  { %v1740_v24 = vpop.eup %1739  ;;  %v1350_v26 = vmul.f32 %v1738_v22, %v1736_v21 }
 0x837   :  { %v1349_v49 = vmul.f32 %v1740_v24, %v2183_v50  ;;  %v1742_v45 = vpop.eup %1741 }
 0x839   :  { %v1351_v27 = vadd.f32 %v1350_v26, %v1349_v49 }
 0x83b   :  { %1743 = vtanh.f32 %v1351_v27 }
 0x845   :  { %v1744_v25 = vpop.eup %1743 }
 0x846   :  { %v1353_v29 = vmul.f32 %v1744_v25, %v1742_v45 }
 0x848   :  { %1559 = vmatmul.mubr.msk.f32.vlgmr.msra.gmra.mrb[48].mxu0 %vm425_vm2, %v1353_v29 }
 0x91b   :  { %v1438_v11 = vpop.f32.mrb[48].mxu0 }
 0x91c   :  { %v1439_v51 = vadd.f32 %v1531_v9, %v1438_v11  ;;  %v1560_v55 = vpop.f32.mrb[49].mxu0 }
 0x91e   :  { %1443 = vst.msk [vmem:[%s2230_s6] sm:$0xff] %vm1442_vm4, %v1439_v51 }

</bundles_post_ra>
